<compile_context>
chip_gen: v7x
topology: tpu7x:2x2x1
jax: 0.10.0
libtpu: 0.0.40
codegen_flags: <defaults>
</compile_context>

<pallas_src>
import functools

import jax
import jax.numpy as jnp
from jax.experimental import pallas as pl
from jax.experimental.pallas import tpu as pltpu


_VMEM_LIMIT_BYTES = 32 * 1024 * 1024        # <= physical VMEM on v5e/v6e/v7x
_FUSED_FOOTPRINT_BUDGET = 24 * 1024 * 1024  # est. live VMEM for fused path
_FALLBACK_BLOCK_BYTES = 2 * 1024 * 1024     # per-step input-block byte target


def _round_down_multiple(n, m):
    return (n // m) * m


# --------------------- primary: fused per-batch kernel ---------------------
def _fused_se_kernel(x_ref, w1t_ref, b1_ref, w2_ref, b2_ref, o_ref):
    """One batch: pool + FC1 + ReLU + FC2 + sigmoid + scale, all in VMEM.

    x_ref, o_ref : (C, HW) f32   (batch dim squeezed away by the BlockSpec)
    w1t_ref      : (C, R)  f32   transpose of the first 1x1-conv weight
    b1_ref       : (1, R)  f32
    w2_ref       : (C, R)  f32
    b2_ref       : (C, 1)  f32
    """
    hw = x_ref.shape[1]
    # Global average pool: per-channel mean over the spatial (lane) axis.
    mean_c = jnp.sum(x_ref[...], axis=1, keepdims=True) * (1.0 / float(hw))  # (C,1)
    # FC1 + ReLU as a VPU broadcast-multiply + sublane reduce (MXU not needed:
    # the kernel is DMA-bound, O(C*R) flops are free filler).
    h = jnp.sum(w1t_ref[...] * mean_c, axis=0, keepdims=True) + b1_ref[...]  # (1,R)
    h = jnp.maximum(h, 0.0)
    # FC2 + sigmoid (lane reduce).
    logits = jnp.sum(w2_ref[...] * h, axis=1, keepdims=True) + b2_ref[...]   # (C,1)
    gate = 1.0 / (1.0 + jnp.exp(-logits))
    # Scale the resident slab and write it back out (x read from HBM once).
    o_ref[...] = x_ref[...] * gate


# ---------------- fallback (a): spatial-mean reduction kernel --------------
def _pool_kernel(x_ref, o_ref, *, hw_total):
    """Accumulate per-channel spatial means over lane-dense HW tiles.

    x_ref : (C, hw_tile) input block (batch dim squeezed)
    o_ref : (C, 1) accumulator, VMEM-resident across the HW grid axis
    """
    j = pl.program_id(1)

    @pl.when(j == 0)
    def _():
        o_ref[...] = jnp.zeros_like(o_ref)

    # Mask the ragged last tile: the out-of-bounds part of a partial input
    # block is undefined and must not reach the sum.
    hw_tile = x_ref.shape[1]
    lane = jax.lax.broadcasted_iota(jnp.int32, x_ref.shape, 1)
    valid = (j * hw_tile + lane) < hw_total
    o_ref[...] += jnp.sum(jnp.where(valid, x_ref[...], 0.0), axis=1,
                          keepdims=True)

    @pl.when(j == pl.num_programs(1) - 1)
    def _():
        o_ref[...] *= 1.0 / float(hw_total)   # emit the mean directly


# ---------------- fallback (c): broadcast elementwise scale ----------------
def _scale_kernel(x_ref, g_ref, o_ref):
    # x_ref/o_ref: (C, hw_tile); g_ref: (C, 1). A ragged last output block is
    # clipped by Pallas, so undefined input lanes never reach HBM.
    o_ref[...] = x_ref[...] * g_ref[...]


@jax.jit
def se_block(x_nchw, w1, b1, w2, b2):
    """SEBlock forward.

    x_nchw : (B, C, H, W) float32
    w1     : (R, C)  first 1x1 conv weight (squeezed from (R, C, 1, 1))
    b1     : (R,)
    w2     : (C, R)  second 1x1 conv weight
    b2     : (C,)
    """
    B, C, H, W = x_nchw.shape
    R = w1.shape[0]
    HW = H * W
    itemsize = 4  # float32 only; bf16 would need 16-sublane tile math.

    x3 = x_nchw.reshape(B, C, HW)   # free reshape, no padding

    slab_bytes = C * HW * itemsize
    weight_bytes = (2 * C * R + R + C) * itemsize
    # in + out double-buffered slabs, double-buffered weights, small temps.
    fused_footprint = 4 * slab_bytes + 2 * weight_bytes + 2 * C * R * itemsize

    if fused_footprint <= _FUSED_FOOTPRINT_BUDGET:
        # ---------- single pass: x is read from HBM exactly once ----------
        # Note: with B == 1 the grid has a single step so only one v7x core
        # is used; splitting HW per batch across cores would need a second
        # reduction phase and is not worth it for a mem-bound op at these sizes.
        w1t = jnp.transpose(w1)        # (C, R)
        b1r = b1.reshape(1, R)
        b2c = b2.reshape(C, 1)
        out3 = pl.pallas_call(
            _fused_se_kernel,
            out_shape=jax.ShapeDtypeStruct((B, C, HW), x3.dtype),
            grid_spec=pltpu.PrefetchScalarGridSpec(
                num_scalar_prefetch=0,
                grid=(B,),
                in_specs=[
                    # Full (C, HW) trailing block: exempt from the (8,128) rule.
                    pl.BlockSpec((None, C, HW), lambda b: (b, 0, 0)),
                    pl.BlockSpec((C, R), lambda b: (0, 0)),
                    pl.BlockSpec((1, R), lambda b: (0, 0)),
                    pl.BlockSpec((C, R), lambda b: (0, 0)),
                    pl.BlockSpec((C, 1), lambda b: (0, 0)),
                ],
                out_specs=pl.BlockSpec((None, C, HW), lambda b: (b, 0, 0)),
            ),
            compiler_params=pltpu.CompilerParams(
                dimension_semantics=("parallel",),
                vmem_limit_bytes=_VMEM_LIMIT_BYTES,
            ),
        )(x3, w1t, b1r, w2, b2c)
        return out3.reshape(B, C, H, W)

    # ---------- fallback: two passes with byte-budgeted HW tiles ----------
    if slab_bytes <= _FALLBACK_BLOCK_BYTES:
        hw_tile = HW        # full extent: exempt from the 128-divisibility rule
    else:
        hw_tile = max(128, _round_down_multiple(
            _FALLBACK_BLOCK_BYTES // (C * itemsize), 128))
    n_hw = pl.cdiv(HW, hw_tile)
    grid = (B, n_hw)

    pooled = pl.pallas_call(
        functools.partial(_pool_kernel, hw_total=HW),
        out_shape=jax.ShapeDtypeStruct((B, C, 1), jnp.float32),
        grid_spec=pltpu.PrefetchScalarGridSpec(
            num_scalar_prefetch=0,
            grid=grid,
            in_specs=[pl.BlockSpec((None, C, hw_tile), lambda b, j: (b, 0, j))],
            out_specs=pl.BlockSpec((None, C, 1), lambda b, j: (b, 0, 0)),
        ),
        compiler_params=pltpu.CompilerParams(
            dimension_semantics=("parallel", "arbitrary"),
            vmem_limit_bytes=_VMEM_LIMIT_BYTES,
        ),
    )(x3)

    # Tiny excitation FCs in plain JAX (negligible next to the big DMAs).
    mean = pooled[:, :, 0]                                      # (B, C)
    h = jnp.maximum(mean @ w1.T + b1[None, :], 0.0)             # (B, R)
    gate = jax.nn.sigmoid(h @ w2.T + b2[None, :])               # (B, C)
    gate3 = gate.astype(x3.dtype)[:, :, None]                   # (B, C, 1)

    out3 = pl.pallas_call(
        _scale_kernel,
        out_shape=jax.ShapeDtypeStruct((B, C, HW), x3.dtype),
        grid_spec=pltpu.PrefetchScalarGridSpec(
            num_scalar_prefetch=0,
            grid=grid,
            in_specs=[
                pl.BlockSpec((None, C, hw_tile), lambda b, j: (b, 0, j)),
                pl.BlockSpec((None, C, 1), lambda b, j: (b, 0, 0)),
            ],
            out_specs=pl.BlockSpec((None, C, hw_tile), lambda b, j: (b, 0, j)),
        ),
        compiler_params=pltpu.CompilerParams(
            dimension_semantics=("parallel", "parallel"),
            vmem_limit_bytes=_VMEM_LIMIT_BYTES,
        ),
    )(x3, gate3)

    return out3.reshape(B, C, H, W)


def se_block_ref(x, w1, b1, w2, b2):
    """Pure-JAX reference matching the PyTorch SEBlock semantics."""
    mean = jnp.mean(x, axis=(2, 3), keepdims=True)                 # (B,C,1,1)
    h = jnp.einsum('rc,bcij->brij', w1, mean) + b1[None, :, None, None]
    h = jax.nn.relu(h)
    s = jnp.einsum('cr,brij->bcij', w2, h) + b2[None, :, None, None]
    return x * jax.nn.sigmoid(s)


if __name__ == "__main__":
    B, C, H, W = 2, 4, 16, 16
    reduction = 4
    R = max(1, C // reduction)

    key = jax.random.PRNGKey(0)
    kx, k1, k2, k3, k4 = jax.random.split(key, 5)

    x = jax.random.normal(kx, (B, C, H, W), dtype=jnp.float32)
    # Deterministic synthetic parameters (shapes from nn.Conv2d(C, R, 1) etc.)
    w1 = jax.random.normal(k1, (R, C), dtype=jnp.float32) * 0.5
    b1 = jax.random.normal(k2, (R,), dtype=jnp.float32) * 0.1
    w2 = jax.random.normal(k3, (C, R), dtype=jnp.float32) * 0.5
    b2 = jax.random.normal(k4, (C,), dtype=jnp.float32) * 0.1

    out = jax.block_until_ready(se_block(x, w1, b1, w2, b2))
    ref = jax.block_until_ready(se_block_ref(x, w1, b1, w2, b2))

    assert out.shape == x.shape
    assert jnp.allclose(out, ref, atol=1e-5, rtol=1e-5), float(
        jnp.max(jnp.abs(out - ref)))
    print("KERNEL_OK")
</pallas_src>

<mosaic_0001>
module attributes {stable_mosaic.version = 11 : i64} {
  func.func @_fused_se_kernel(%arg0: i32, %arg1: memref<1x4x256xf32, #tpu.memory_space<vmem>>, %arg2: memref<4x1xf32, #tpu.memory_space<vmem>>, %arg3: memref<1x1xf32, #tpu.memory_space<vmem>>, %arg4: memref<4x1xf32, #tpu.memory_space<vmem>>, %arg5: memref<4x1xf32, #tpu.memory_space<vmem>>, %arg6: memref<1x4x256xf32, #tpu.memory_space<vmem>>) attributes {dimension_semantics = [#tpu.dimension_semantics<parallel>], iteration_bounds = array<i64: 2>, scalar_prefetch = 0 : i64, scratch_operands = 0 : i64, tpu.core_type = #tpu.core_type<tc>, window_params = [{transform_indices = @transform_0, window_bounds = array<i64: 1, 4, 256>}, {pipeline_mode = #tpu.pipeline_mode<synchronous>, transform_indices = @transform_1, window_bounds = array<i64: 4, 1>}, {pipeline_mode = #tpu.pipeline_mode<synchronous>, transform_indices = @transform_2, window_bounds = array<i64: 1, 1>}, {pipeline_mode = #tpu.pipeline_mode<synchronous>, transform_indices = @transform_3, window_bounds = array<i64: 4, 1>}, {pipeline_mode = #tpu.pipeline_mode<synchronous>, transform_indices = @transform_4, window_bounds = array<i64: 4, 1>}, {transform_indices = @transform_5, window_bounds = array<i64: 1, 4, 256>}]} {
    %c0 = arith.constant 0 : index
    %c0_0 = arith.constant 0 : index
    %c0_1 = arith.constant 0 : index
    %0 = vector.load %arg1[%c0, %c0_0, %c0_1] : memref<1x4x256xf32, #tpu.memory_space<vmem>>, vector<1x4x256xf32>
    %1 = vector.shape_cast %0 : vector<1x4x256xf32> to vector<4x256xf32>
    %cst = arith.constant dense<0.000000e+00> : vector<4xf32>
    %2 = vector.multi_reduction <add>, %1, %cst [1] : vector<4x256xf32> to vector<4xf32>
    %3 = vector.shape_cast %2 : vector<4xf32> to vector<4x1xf32>
    %cst_2 = arith.constant 3.906250e-03 : f32
    %4 = vector.broadcast %cst_2 : f32 to vector<4x1xf32>
    %5 = arith.mulf %3, %4 : vector<4x1xf32>
    %c0_3 = arith.constant 0 : index
    %c0_4 = arith.constant 0 : index
    %6 = vector.load %arg2[%c0_3, %c0_4] : memref<4x1xf32, #tpu.memory_space<vmem>>, vector<4x1xf32>
    %7 = arith.mulf %6, %5 : vector<4x1xf32>
    %cst_5 = arith.constant dense<0.000000e+00> : vector<1xf32>
    %8 = vector.multi_reduction <add>, %7, %cst_5 [0] : vector<4x1xf32> to vector<1xf32>
    %9 = vector.shape_cast %8 : vector<1xf32> to vector<1x1xf32>
    %c0_6 = arith.constant 0 : index
    %c0_7 = arith.constant 0 : index
    %10 = vector.load %arg3[%c0_6, %c0_7] : memref<1x1xf32, #tpu.memory_space<vmem>>, vector<1x1xf32>
    %11 = arith.addf %9, %10 : vector<1x1xf32>
    %cst_8 = arith.constant 0.000000e+00 : f32
    %12 = vector.broadcast %cst_8 : f32 to vector<1x1xf32>
    %13 = arith.maximumf %11, %12 : vector<1x1xf32>
    %c0_9 = arith.constant 0 : index
    %c0_10 = arith.constant 0 : index
    %14 = vector.load %arg4[%c0_9, %c0_10] : memref<4x1xf32, #tpu.memory_space<vmem>>, vector<4x1xf32>
    %15 = vector.broadcast %13 : vector<1x1xf32> to vector<4x1xf32>
    %16 = arith.mulf %14, %15 : vector<4x1xf32>
    %cst_11 = arith.constant dense<0.000000e+00> : vector<4xf32>
    %17 = vector.multi_reduction <add>, %16, %cst_11 [1] : vector<4x1xf32> to vector<4xf32>
    %18 = vector.shape_cast %17 : vector<4xf32> to vector<4x1xf32>
    %c0_12 = arith.constant 0 : index
    %c0_13 = arith.constant 0 : index
    %19 = vector.load %arg5[%c0_12, %c0_13] : memref<4x1xf32, #tpu.memory_space<vmem>>, vector<4x1xf32>
    %20 = arith.addf %18, %19 : vector<4x1xf32>
    %cst_14 = arith.constant 0.000000e+00 : f32
    %21 = vector.broadcast %cst_14 : f32 to vector<4x1xf32>
    %22 = arith.subf %21, %20 : vector<4x1xf32>
    %23 = math.exp %22 : vector<4x1xf32>
    %cst_15 = arith.constant 1.000000e+00 : f32
    %24 = vector.broadcast %cst_15 : f32 to vector<4x1xf32>
    %25 = arith.addf %24, %23 : vector<4x1xf32>
    %cst_16 = arith.constant 1.000000e+00 : f32
    %26 = vector.broadcast %cst_16 : f32 to vector<4x1xf32>
    %27 = arith.divf %26, %25 : vector<4x1xf32>
    %c0_17 = arith.constant 0 : index
    %c0_18 = arith.constant 0 : index
    %c0_19 = arith.constant 0 : index
    %28 = vector.load %arg1[%c0_17, %c0_18, %c0_19] : memref<1x4x256xf32, #tpu.memory_space<vmem>>, vector<1x4x256xf32>
    %29 = vector.shape_cast %28 : vector<1x4x256xf32> to vector<4x256xf32>
    %30 = vector.broadcast %27 : vector<4x1xf32> to vector<4x256xf32>
    %31 = arith.mulf %29, %30 : vector<4x256xf32>
    %c0_20 = arith.constant 0 : index
    %c0_21 = arith.constant 0 : index
    %c0_22 = arith.constant 0 : index
    %32 = vector.load %arg6[%c0_20, %c0_21, %c0_22] : memref<1x4x256xf32, #tpu.memory_space<vmem>>, vector<1x4x256xf32>
    %33 = vector.shape_cast %32 : vector<1x4x256xf32> to vector<4x256xf32>
    %34 = vector.shape_cast %31 : vector<4x256xf32> to vector<1x4x256xf32>
    tpu.vector_store %arg6[%c0_20, %c0_21, %c0_22], %34 {strides = array<i32>} : memref<1x4x256xf32, #tpu.memory_space<vmem>>, vector<1x4x256xf32>,
    return
  }
  func.func @transform_0(%arg0: i32) -> (i32, i32, i32) {
    %c0_i32 = arith.constant 0 : i32
    %c0_i32_0 = arith.constant 0 : i32
    %c0_i32_1 = arith.constant 0 : i32
    return %arg0, %c0_i32, %c0_i32_0 : i32, i32, i32
  }
  func.func @transform_1(%arg0: i32) -> (i32, i32) {
    %c0_i32 = arith.constant 0 : i32
    %c0_i32_0 = arith.constant 0 : i32
    %c0_i32_1 = arith.constant 0 : i32
    return %c0_i32, %c0_i32_0 : i32, i32
  }
  func.func @transform_2(%arg0: i32) -> (i32, i32) {
    %c0_i32 = arith.constant 0 : i32
    %c0_i32_0 = arith.constant 0 : i32
    %c0_i32_1 = arith.constant 0 : i32
    return %c0_i32, %c0_i32_0 : i32, i32
  }
  func.func @transform_3(%arg0: i32) -> (i32, i32) {
    %c0_i32 = arith.constant 0 : i32
    %c0_i32_0 = arith.constant 0 : i32
    %c0_i32_1 = arith.constant 0 : i32
    return %c0_i32, %c0_i32_0 : i32, i32
  }
  func.func @transform_4(%arg0: i32) -> (i32, i32) {
    %c0_i32 = arith.constant 0 : i32
    %c0_i32_0 = arith.constant 0 : i32
    %c0_i32_1 = arith.constant 0 : i32
    return %c0_i32, %c0_i32_0 : i32, i32
  }
  func.func @transform_5(%arg0: i32) -> (i32, i32, i32) {
    %c0_i32 = arith.constant 0 : i32
    %c0_i32_0 = arith.constant 0 : i32
    %c0_i32_1 = arith.constant 0 : i32
    return %arg0, %c0_i32, %c0_i32_0 : i32, i32, i32
  }
}

</mosaic_0001>

<bundles_post_ra>
// kernel: se_block.1
= control target key start
LH: loop header
LB: loop body
LE: loop exit
PB: predicated region body
PF: predicated region fallthrough
CT: control target
= control target key end

     0   :  { %s407_s20 = smov 0   ;;  %s440_s0 = inlined_call_operand.vmem [shape: f32[2,4,256], index: 0, kind: input, shape index: {}]   ;;  %s441_s1 = inlined_call_operand.vmem [shape: f32[4,1], index: 1, kind: input, shape index: {}]   ;;  %s442_s2 = inlined_call_operand.<no memory space> [shape: f32[1,1], index: 2, kind: input, shape index: {}]   ;;  %s443_s3 = inlined_call_operand.vmem [shape: f32[4,1], index: 3, kind: input, shape index: {}]   ;;  %s444_s4 = inlined_call_operand.vmem [shape: f32[4,1], index: 4, kind: input, shape index: {}]   ;;  %s445_s5 = inlined_call_operand.vmem [shape: f32[2,4,256], index: 5, kind: output, shape index: {}]  }
   0x1   :  { %v10_v0 = vstv %s442_s2 }
   0x2   :  { %11 = vst [vmem:[#allocation2] sm:$0x1] %v10_v0 }
   0x3 LB: > { %s335_s21 = sadd.s32 4294967295, %s370_s20   ;;  %p339_p0 = scmp.ge.s32.totalorder %s370_s20, 1  ;;  %s370_s20 = sphi %s407_s20, %s17_s20  }
   0x4   : > { %p189_p1 = scmp.lt.s32.totalorder %s370_s20, 3 }
   0x6   : > { %p190_p2 = pnand %p339_p0, %p189_p1 }
   0x7   : > { %p217_p3 = scmp.lt.s32.totalorder (!%p190_p2), %s335_s21, 1  ;;  %vm231_vm0 = vcmask (!%p190_p2), 1043456   ;;  %v372_v6 = vmov (!%p190_p2), 0   ;;  %v238_v7 = vld [vmem:[%s441_s1] sm:$0xf] (!%p190_p2)  ;;  %vm240_vm1 = vcmask (!%p190_p2), 3072   ;;  %v252_v14 = vlaneseq (!%p190_p2) }
   0x8   : > { %193 = sbr.rel (%p190_p2) target bundleno = 354 (0x162), region = 40  ;;  %358 = vset.pattern.permute.xlu0 (!%p190_p2), %v372_v6  ;;  %v251_v24 = vld [vmem:[%s443_s3] sm:$0xf] (!%p190_p2)  ;;  %v373_v34 = vmov (!%p190_p2), 839922192  }
   0x9   : > { %v253_v17 = vshrl.u32 (!%p190_p2), %v252_v14, 7  ;;  %v248_v19 = vld [vmem:[#allocation2] sm:$0x1] (!%p190_p2)  ;;  %v271_v35 = vunpack.c.l.s4 (!%p190_p2), %v373_v34 }
   0xa   : > { %v258_v26 = vld [vmem:[%s444_s4] sm:$0xf] (!%p190_p2) }
   0xb   : > { %v254_v21 = vsub.s32 (!%p190_p2), 0, %v253_v17  ;;  %v272_v36 = vunpack.c.0.s8 (!%p190_p2), %v271_v35 }
   0xd   : > { %v275_v37 = vsub.s32 (!%p190_p2), %v272_v36, %v253_v17 }
   0xf   : > { %s447_s21 = smov (!%p217_p3, %s335_s21), 1 }
  0x10   : > { %s346_s2 = sshll.u32 %s447_s21, 3 }
  0x11   : > { %s221_s24 = scalar_lea.vmem %s440_s0, %s346_s2  ;;  %s226_s8 = scalar_lea.vmem %s445_s5, %s346_s2 }
  0x12   : > { %v227_v1 = vld [vmem:[%s221_s24] sm:$0xff] }
  0x13   : > { %v229_v2 = vcombine.high %v227_v1, %v227_v1  ;;  %v232_v3 = vsel %vm231_vm0, %v227_v1, 0.0 }
  0x15   : > { %v233_v4 = vsel %vm231_vm0, %v229_v2, 0.0 }
  0x16   : > { %v234_v5 = vadd.f32 %v233_v4, %v232_v3 }
  0x18   : > { %235 = vadd.xlane.f32.xlu0 %v234_v5 }
  0xa5   : > { %v236_v8 = vpop.xlane.xlu0 %235 }
  0xa6   : > { %v237_v9 = vmul.f32 0.00390625, %v236_v8 }
  0xa8   : > { %v239_v10 = vmul.f32 %v238_v7, %v237_v9 }
  0xaa   : > { %v241_v11 = vsel %vm240_vm1, %v239_v10, 0.0 }
  0xab   : > { %v242_v12 = vrot.slane %v241_v11, 4 }
  0xad   : > { %v243_v13 = vadd.f32 %v242_v12, %v241_v11 }
  0xaf   : > { %v244_v15 = vrot.slane %v243_v13, 2 }
  0xb1   : > { %v245_v16 = vadd.f32 %v244_v15, %v243_v13 }
  0xb3   : > { %v246_v18 = vrot.slane %v245_v16, 1 }
  0xb5   : > { %v247_v20 = vadd.f32 %v246_v18, %v245_v16 }
  0xb7   : > { %v249_v22 = vadd.f32 %v248_v19, %v247_v20 }
  0xb9   : > { %v250_v23 = vmax.f32 %v249_v22, 0.0 }
  0xbb   : > { %v255_v25 = vrot.slane %v250_v23, %v254_v21 }
  0xbd   : > { %v256_v27 = vmul.f32 %v255_v25, %v251_v24 }
  0xbf   : > { %v259_v28 = vadd.f32 %v258_v26, %v256_v27 }
  0xc1   : > { %v260_v29 = vsub.f32 0.0, %v259_v28 }
  0xc3   : > { %v261_v30 = vmul.f32 1.442695, %v260_v29 }
  0xc5   : > { %360 = vpow2.f32 %v261_v30 }
  0xcf   : > { %v361_v31 = vpop.eup %360 }
  0xd0   : > { %v263_v32 = vadd.f32 1.0, %v361_v31 }
  0xd2   : > { %362 = vrcp.f32 %v263_v32 }
  0xdc   : > { %v363_v33 = vpop.eup %362 }
  0xdd   : > { %268 = vperm.xlu0 %358, %v363_v33  }
 0x15c   : > { %v269_v38 = vpop.permute.xlu0 %268 }
 0x15d   : > { %v276_v39 = vrot.slane %v269_v38, %v275_v37 }
 0x15f   : > { %v278_v40 = vmul.f32 %v276_v39, %v227_v1 }
 0x161   : > { %279 = vst [vmem:[%s226_s8] sm:$0xff] %v278_v40 }
 0x162 PF: > { %s17_s20 = sadd.s32 1, %s370_s20  }
 0x163   : > { %p14_p4 = scmp.ge.s32.totalorder %s17_s20, 4  }
 0x165   :  { %16 = sbr.rel (!%p14_p4) target bundleno = 3 (0x3), region = 70 }

</bundles_post_ra>
